<compile_context>
chip_gen: v7x
topology: tpu7x:2x2x1
jax: 0.10.0
libtpu: 0.0.40
codegen_flags: <defaults>
</compile_context>

<pallas_src>
import functools
import math

import jax
import jax.numpy as jnp
import numpy as np
from jax.experimental import pallas as pl
from jax.experimental.pallas import tpu as pltpu


_SMALL_HW_MAX = 512  # fused kron(D1, D2) path for H*W up to this size


# --------------------------------------------------------------------------- #
# DCT basis
# --------------------------------------------------------------------------- #
def _dct_matrix(n, norm="ortho"):
    """DCT-II basis matrix, identical to the torch construction."""
    idx = jnp.arange(n, dtype=jnp.float32)
    mat = jnp.cos(jnp.outer(idx + 0.5, idx) * jnp.pi / n)
    if norm == "ortho":
        mat = mat.at[:, 0].multiply(1.0 / np.sqrt(2.0))
        mat = mat * jnp.sqrt(jnp.asarray(2.0 / n, dtype=jnp.float32))
    return mat


# --------------------------------------------------------------------------- #
# Kernels
# --------------------------------------------------------------------------- #
def _dct_loss_kernel_kron(x_ref, y_ref, kd_ref, o_ref):
    """Small-H*W path: one dense (tbc, HW) @ (HW, HW) matmul per block."""
    diff = x_ref[...].astype(jnp.float32) - y_ref[...].astype(jnp.float32)
    dct = jnp.dot(diff, kd_ref[...], preferred_element_type=jnp.float32)
    partial = jnp.sum(jnp.abs(dct))
    # Unmasked full-block store of the partial sum (value at [0, 0]).
    row = jax.lax.broadcasted_iota(jnp.int32, o_ref.shape, 0)
    col = jax.lax.broadcasted_iota(jnp.int32, o_ref.shape, 1)
    o_ref[...] = jnp.where((row == 0) & (col == 0), partial, 0.0)


def _dct_loss_kernel_sep(x_ref, y_ref, d1t_ref, d2_ref, o_ref, *, tbc, h):
    """Large-H*W path: separable transform over `tbc` stacked (H, W) slices."""
    diff = x_ref[...].astype(jnp.float32) - y_ref[...].astype(jnp.float32)
    # W-side transform for all slices at once: (tbc*H, W) @ (W, W).
    t = jnp.dot(diff, d2_ref[...], preferred_element_type=jnp.float32)
    partial = jnp.float32(0.0)
    for s in range(tbc):  # tbc <= 8, static unroll
        u = jnp.dot(d1t_ref[...], t[s * h:(s + 1) * h, :],
                    preferred_element_type=jnp.float32)
        partial = partial + jnp.sum(jnp.abs(u))
    row = jax.lax.broadcasted_iota(jnp.int32, o_ref.shape, 0)
    col = jax.lax.broadcasted_iota(jnp.int32, o_ref.shape, 1)
    o_ref[...] = jnp.where((row == 0) & (col == 0), partial, 0.0)


# --------------------------------------------------------------------------- #
# Planning helpers
# --------------------------------------------------------------------------- #
def _vmem_capacity_bytes():
    try:
        return int(pltpu.get_tpu_info().vmem_capacity_bytes)
    except Exception:
        return 64 << 20  # conservative (v7x-sized) fallback


def _vmem_limit(needed, cap):
    hi = max(int(cap * 0.6), 16 << 20)
    lim = min(max(2 * needed, 16 << 20), hi)
    lim = max(lim, min(int(1.25 * needed) + (1 << 20), int(cap * 0.9)))
    return int(lim)


def _plan_small(bc, hw, itemsize, byte_target):
    """Rows-per-block plan for the (BC, H*W) layout."""
    align = 8
    bc_al = -(-bc // align) * align
    target = max(align, (byte_target // (hw * itemsize)) // align * align)
    min_blocks = 4 if bc_al >= 4 * align else 2     # keep both v7x TCs busy
    tbc = min(target, max(align, (bc_al // min_blocks) // align * align))
    while bc_al % tbc:                              # prefer no ragged block
        tbc -= align
    nblocks = max(min_blocks, bc_al // tbc)
    return tbc, nblocks, nblocks * tbc


def _plan_large(bc, h, w, itemsize, byte_target):
    """Slices-per-block plan for the (BC*H, W) layout."""
    align = 8 // math.gcd(h, 8)                     # (tbc*H) % 8 == 0
    cap = max(1, min(8, byte_target // max(1, h * w * itemsize)))
    cap = max(align, (cap // align) * align)
    bc_al = -(-bc // align) * align
    tbc = align
    for cand in range(cap, align - 1, -align):
        if bc_al % cand == 0 and (bc_al // cand >= 2 or bc_al <= align):
            tbc = cand
            break
    nblocks = -(-bc_al // tbc)
    return tbc, nblocks, nblocks * tbc


# --------------------------------------------------------------------------- #
# Wrappers
# --------------------------------------------------------------------------- #
def _dct_loss_small(x, y, d1, d2, byte_target, vmem_cap, itemsize):
    B, C, H, W = x.shape
    BC, HW = B * C, H * W
    tbc, nblocks, rows = _plan_small(BC, HW, itemsize, byte_target)

    x2 = x.reshape(BC, HW)
    y2 = y.reshape(BC, HW)
    pad = rows - BC
    if pad:  # zero slices contribute exactly 0 to sum|dct|; pad is tiny here
        x2 = jnp.pad(x2, ((0, pad), (0, 0)))
        y2 = jnp.pad(y2, ((0, pad), (0, 0)))

    # vec_row(D1^T A D2) = vec_row(A) @ kron(D1, D2)
    kd = jnp.kron(d1, d2)  # (HW, HW)

    flops = 2 * rows * HW * HW
    bytes_accessed = 2 * rows * HW * itemsize + HW * HW * 4 + nblocks * 8 * 128 * 4
    vmem_needed = (2 * 2 * tbc * HW * itemsize      # x, y double-buffered
                   + HW * HW * 4                    # kd, single-buffered
                   + 2 * 8 * 128 * 4)               # out, double-buffered
    vmem_limit = _vmem_limit(vmem_needed, vmem_cap)

    return pl.pallas_call(
        _dct_loss_kernel_kron,
        out_shape=jax.ShapeDtypeStruct((nblocks * 8, 128), jnp.float32),
        grid_spec=pltpu.PrefetchScalarGridSpec(
            num_scalar_prefetch=0,
            grid=(nblocks,),
            in_specs=[
                pl.BlockSpec((tbc, HW), lambda i: (i, 0)),
                pl.BlockSpec((tbc, HW), lambda i: (i, 0)),
                pl.BlockSpec((HW, HW), lambda i: (0, 0),
                             pipeline_mode=pl.Buffered(1)),
            ],
            out_specs=pl.BlockSpec((8, 128), lambda i: (i, 0)),
        ),
        compiler_params=pltpu.CompilerParams(
            dimension_semantics=("parallel",),
            vmem_limit_bytes=vmem_limit),
        cost_estimate=pl.CostEstimate(
            flops=flops, transcendentals=0, bytes_accessed=bytes_accessed),
    )(x2, y2, kd)


def _dct_loss_large(x, y, d1, d2, byte_target, vmem_cap, itemsize):
    B, C, H, W = x.shape
    BC = B * C
    tbc, nblocks, slices = _plan_large(BC, H, W, itemsize, byte_target)
    R = tbc * H

    x2 = x.reshape(BC * H, W)
    y2 = y.reshape(BC * H, W)
    pad_rows = slices * H - BC * H
    if pad_rows:
        x2 = jnp.pad(x2, ((0, pad_rows), (0, 0)))
        y2 = jnp.pad(y2, ((0, pad_rows), (0, 0)))

    d1t = d1.T  # (H, H)
    # TODO(synk): for extreme H/W (DCT matrices themselves >> VMEM), tile the
    # (H,H)/(W,W) matrices over an extra "arbitrary" K-reduction grid axis.

    flops = 2 * slices * H * W * (H + W)
    bytes_accessed = (2 * slices * H * W * itemsize
                      + (H * H + W * W) * 4
                      + nblocks * 8 * 128 * 4)
    vmem_needed = (2 * 2 * R * W * itemsize         # x, y double-buffered
                   + (H * H + W * W) * 4            # D1^T, D2 single-buffered
                   + 2 * 8 * 128 * 4)
    vmem_limit = _vmem_limit(vmem_needed, vmem_cap)

    kernel = functools.partial(_dct_loss_kernel_sep, tbc=tbc, h=H)
    return pl.pallas_call(
        kernel,
        out_shape=jax.ShapeDtypeStruct((nblocks * 8, 128), jnp.float32),
        grid_spec=pltpu.PrefetchScalarGridSpec(
            num_scalar_prefetch=0,
            grid=(nblocks,),
            in_specs=[
                pl.BlockSpec((R, W), lambda i: (i, 0)),
                pl.BlockSpec((R, W), lambda i: (i, 0)),
                pl.BlockSpec((H, H), lambda i: (0, 0),
                             pipeline_mode=pl.Buffered(1)),
                pl.BlockSpec((W, W), lambda i: (0, 0),
                             pipeline_mode=pl.Buffered(1)),
            ],
            out_specs=pl.BlockSpec((8, 128), lambda i: (i, 0)),
        ),
        compiler_params=pltpu.CompilerParams(
            dimension_semantics=("parallel",),
            vmem_limit_bytes=vmem_limit),
        cost_estimate=pl.CostEstimate(
            flops=flops, transcendentals=0, bytes_accessed=bytes_accessed),
    )(x2, y2, d1t, d2)


def dct_loss(x, y):
    """Pallas implementation of DCTLoss.forward(x, y).  x, y: (B, C, H, W)."""
    B, C, H, W = x.shape
    itemsize = jnp.dtype(x.dtype).itemsize
    vmem_cap = _vmem_capacity_bytes()
    # DMA-byte target per input block (~0.5-1 MiB on v7x, ~2 MiB on v5e/v6e).
    byte_target = (1 << 20) if vmem_cap <= (64 << 20) else (2 << 20)

    d1 = _dct_matrix(H)
    d2 = _dct_matrix(W)

    if H * W <= _SMALL_HW_MAX:
        partials = _dct_loss_small(x, y, d1, d2, byte_target, vmem_cap, itemsize)
    else:
        partials = _dct_loss_large(x, y, d1, d2, byte_target, vmem_cap, itemsize)

    # per-channel mean over B*H*W elements, summed over C, divided by C.
    return jnp.sum(partials) / (B * H * W) / C


# --------------------------------------------------------------------------- #
# Pure-JAX reference (mirror of the PyTorch module)
# --------------------------------------------------------------------------- #
def _dct_loss_ref(x, y):
    B, C, H, W = x.shape
    d1 = _dct_matrix(H)
    d2 = _dct_matrix(W)

    def dct2d(a):  # a: (..., H, W)
        return jnp.einsum("hi,...hw,wj->...ij", d1, a, d2)

    loss = 0.0
    for c in range(C):
        xd = dct2d(x[:, c][:, None])
        yd = dct2d(y[:, c][:, None])
        loss = loss + jnp.mean(jnp.abs(xd - yd))
    return loss / C


if __name__ == "__main__":
    key = jax.random.PRNGKey(0)
    k1, k2, k3, k4 = jax.random.split(key, 4)

    # Case 1: small H*W -> fused kron(D1, D2) path.
    B, C, H, W = 2, 4, 16, 16
    x = jax.random.normal(k1, (B, C, H, W), dtype=jnp.float32)
    y = jax.random.normal(k2, (B, C, H, W), dtype=jnp.float32)
    out = jax.block_until_ready(jax.jit(dct_loss)(x, y))
    ref = jax.block_until_ready(_dct_loss_ref(x, y))
    np.testing.assert_allclose(np.asarray(out), np.asarray(ref),
                               rtol=2e-5, atol=2e-5)

    # Case 2: larger H*W -> separable path.
    B2, C2, H2, W2 = 1, 2, 32, 128
    x2 = jax.random.normal(k3, (B2, C2, H2, W2), dtype=jnp.float32)
    y2 = jax.random.normal(k4, (B2, C2, H2, W2), dtype=jnp.float32)
    out2 = jax.block_until_ready(jax.jit(dct_loss)(x2, y2))
    ref2 = jax.block_until_ready(_dct_loss_ref(x2, y2))
    np.testing.assert_allclose(np.asarray(out2), np.asarray(ref2),
                               rtol=2e-5, atol=2e-5)

    print("KERNEL_OK")
</pallas_src>

<mosaic_0001>
module attributes {stable_mosaic.version = 11 : i64} {
  func.func @_dct_loss_kernel_kron(%arg0: i32, %arg1: memref<8x256xf32, #tpu.memory_space<vmem>>, %arg2: memref<8x256xf32, #tpu.memory_space<vmem>>, %arg3: memref<256x256xf32, #tpu.memory_space<vmem>>, %arg4: memref<8x128xf32, #tpu.memory_space<vmem>>) attributes {dimension_semantics = [#tpu.dimension_semantics<parallel>], iteration_bounds = array<i64: 2>, scalar_prefetch = 0 : i64, scratch_operands = 0 : i64, tpu.core_type = #tpu.core_type<tc>, window_params = [{transform_indices = @transform_0, window_bounds = array<i64: 8, 256>}, {transform_indices = @transform_1, window_bounds = array<i64: 8, 256>}, {pipeline_mode = #tpu.pipeline_mode<synchronous>, transform_indices = @transform_2, window_bounds = array<i64: 256, 256>}, {transform_indices = @transform_3, window_bounds = array<i64: 8, 128>}]} {
    %c0 = arith.constant 0 : index
    %c0_0 = arith.constant 0 : index
    %0 = vector.load %arg1[%c0, %c0_0] : memref<8x256xf32, #tpu.memory_space<vmem>>, vector<8x256xf32>
    %c0_1 = arith.constant 0 : index
    %c0_2 = arith.constant 0 : index
    %1 = vector.load %arg2[%c0_1, %c0_2] : memref<8x256xf32, #tpu.memory_space<vmem>>, vector<8x256xf32>
    %2 = arith.subf %0, %1 : vector<8x256xf32>
    %c0_3 = arith.constant 0 : index
    %c0_4 = arith.constant 0 : index
    %3 = vector.load %arg3[%c0_3, %c0_4] : memref<256x256xf32, #tpu.memory_space<vmem>>, vector<256x256xf32>
    %cst = arith.constant dense<0.000000e+00> : vector<8x256xf32>
    %4 = tpu.matmul %2, %3, %cst {dimension_numbers = #tpu.dot_dimension_numbers<[1], [0], [0], [1], [0, 0, 1, 1], [], []>} : vector<8x256xf32>, vector<256x256xf32>, vector<8x256xf32> -> vector<8x256xf32>
    %5 = math.absf %4 : vector<8x256xf32>
    %6 = vector.shape_cast %5 : vector<8x256xf32> to vector<1x8x256xf32>
    %cst_5 = arith.constant dense<0.000000e+00> : vector<1xf32>
    %7 = vector.multi_reduction <add>, %6, %cst_5 [1, 2] : vector<1x8x256xf32> to vector<1xf32>
    %8 = vector.shape_cast %7 : vector<1xf32> to vector<1x1x1xf32>
    %9 = vector.extract %8[0, 0, 0] : f32 from vector<1x1x1xf32>
    %10 = tpu.iota {dimensions = array<i32: 0>} : vector<8x128xi32>
    %11 = tpu.iota {dimensions = array<i32: 1>} : vector<8x128xi32>
    %c0_i32 = arith.constant 0 : i32
    %12 = vector.broadcast %c0_i32 : i32 to vector<8x128xi32>
    %13 = arith.cmpi eq, %10, %12 : vector<8x128xi32>
    %c0_i32_6 = arith.constant 0 : i32
    %14 = vector.broadcast %c0_i32_6 : i32 to vector<8x128xi32>
    %15 = arith.cmpi eq, %11, %14 : vector<8x128xi32>
    %16 = arith.andi %13, %15 : vector<8x128xi1>
    %cst_7 = arith.constant 0.000000e+00 : f32
    %17 = vector.broadcast %9 : f32 to vector<8x128xf32>
    %18 = vector.broadcast %cst_7 : f32 to vector<8x128xf32>
    %19 = arith.select %16, %17, %18 : vector<8x128xi1>, vector<8x128xf32>
    %c0_8 = arith.constant 0 : index
    %c0_9 = arith.constant 0 : index
    %20 = vector.load %arg4[%c0_8, %c0_9] : memref<8x128xf32, #tpu.memory_space<vmem>>, vector<8x128xf32>
    tpu.vector_store %arg4[%c0_8, %c0_9], %19 {strides = array<i32>} : memref<8x128xf32, #tpu.memory_space<vmem>>, vector<8x128xf32>,
    return
  }
  func.func @transform_0(%arg0: i32) -> (i32, i32) {
    %c0_i32 = arith.constant 0 : i32
    %c0_i32_0 = arith.constant 0 : i32
    return %arg0, %c0_i32 : i32, i32
  }
  func.func @transform_1(%arg0: i32) -> (i32, i32) {
    %c0_i32 = arith.constant 0 : i32
    %c0_i32_0 = arith.constant 0 : i32
    return %arg0, %c0_i32 : i32, i32
  }
  func.func @transform_2(%arg0: i32) -> (i32, i32) {
    %c0_i32 = arith.constant 0 : i32
    %c0_i32_0 = arith.constant 0 : i32
    %c0_i32_1 = arith.constant 0 : i32
    return %c0_i32, %c0_i32_0 : i32, i32
  }
  func.func @transform_3(%arg0: i32) -> (i32, i32) {
    %c0_i32 = arith.constant 0 : i32
    %c0_i32_0 = arith.constant 0 : i32
    return %arg0, %c0_i32 : i32, i32
  }
}

</mosaic_0001>

<bundles_post_ra>
// kernel: dct_loss.1
= control target key start
LH: loop header
LB: loop body
LE: loop exit
PB: predicated region body
PF: predicated region fallthrough
CT: control target
= control target key end

     0   :  { %s533_s12 = smov 0   ;;  %s761_s0 = inlined_call_operand.vmem [shape: f32[16,256], index: 0, kind: input, shape index: {}]   ;;  %s762_s1 = inlined_call_operand.vmem [shape: f32[16,256], index: 1, kind: input, shape index: {}]   ;;  %s763_s2 = inlined_call_operand.vmem [shape: f32[256,256], index: 2, kind: input, shape index: {}]   ;;  %s764_s3 = inlined_call_operand.vmem [shape: f32[16,128], index: 3, kind: output, shape index: {}]  }
   0x1 LB: > { %s417_s13 = sadd.s32 4294967295, %s511_s12   ;;  %p421_p0 = scmp.ge.s32.totalorder %s511_s12, 1  ;;  %s511_s12 = sphi %s533_s12, %s13_s12  }
   0x2   : > { %p147_p1 = scmp.lt.s32.totalorder %s511_s12, 3 }
   0x4   : > { %p148_p2 = pnand %p421_p0, %p147_p1 }
   0x5   : > { %v196_v0 = vld [vmem:[%s763_s2 + $0x8] sm:$0xff] (!%p148_p2)  ;;  %v198_v1 = vld [vmem:[%s763_s2 + $0x18] sm:$0xff] (!%p148_p2)  ;;  %v195_v2 = vld [vmem:[%s763_s2] sm:$0xff] (!%p148_p2)  ;;  %p175_p3 = scmp.lt.s32.totalorder (!%p148_p2), %s417_s13, 1 }
   0x6   : > { %151 = sbr.rel (%p148_p2) target bundleno = 496 (0x1f0), region = 32  ;;  %v431_v3 = vpack.c.bf16 (!%p148_p2), %v198_v1, %v196_v0  ;;  %v197_v4 = vld [vmem:[%s763_s2 + $0x10] sm:$0xff] (!%p148_p2)  ;;  %v200_v5 = vld [vmem:[%s763_s2 + $0x28] sm:$0xff] (!%p148_p2)  ;;  %v202_v6 = vld [vmem:[%s763_s2 + $0x38] sm:$0xff] (!%p148_p2) }
   0x7   : > { %v433_v7 = vpack.c.bf16 (!%p148_p2), %v197_v4, %v195_v2  ;;  %v435_v8 = vpack.c.bf16 (!%p148_p2), %v202_v6, %v200_v5  ;;  %v199_v9 = vld [vmem:[%s763_s2 + $0x20] sm:$0xff] (!%p148_p2)  ;;  %v201_v10 = vld [vmem:[%s763_s2 + $0x30] sm:$0xff] (!%p148_p2)  ;;  %v204_v11 = vld [vmem:[%s763_s2 + $0x48] sm:$0xff] (!%p148_p2) }
   0x8   : > { %432 = vmatprep.subr.bf16.mxu0 (!%p148_p2), %v431_v3  ;;  %v206_v12 = vld [vmem:[%s763_s2 + $0x58] sm:$0xff] (!%p148_p2)  ;;  %v437_v13 = vpack.c.bf16 (!%p148_p2), %v201_v10, %v199_v9  ;;  %v203_v15 = vld [vmem:[%s763_s2 + $0x40] sm:$0xff] (!%p148_p2)  ;;  %v205_v16 = vld [vmem:[%s763_s2 + $0x50] sm:$0xff] (!%p148_p2) }
   0x9   : > { %434 = vmatpush1.bf16.msra.mxu0 (!%p148_p2), %v433_v7  ;;  %v439_v14 = vpack.c.bf16 (!%p148_p2), %v206_v12, %v204_v11  ;;  %v208_v17 = vld [vmem:[%s763_s2 + $0x68] sm:$0xff] (!%p148_p2)  ;;  %v210_v18 = vld [vmem:[%s763_s2 + $0x78] sm:$0xff] (!%p148_p2)  ;;  %v441_v19 = vpack.c.bf16 (!%p148_p2), %v205_v16, %v203_v15  ;;  %v207_v21 = vld [vmem:[%s763_s2 + $0x60] sm:$0xff] (!%p148_p2) }
   0xa   : > { %436 = vmatprep.subr.bf16.mxu0 (!%p148_p2), %v435_v8  ;;  %v443_v20 = vpack.c.bf16 (!%p148_p2), %v210_v18, %v208_v17  ;;  %v209_v22 = vld [vmem:[%s763_s2 + $0x70] sm:$0xff] (!%p148_p2)  ;;  %v212_v23 = vld [vmem:[%s763_s2 + $0x88] sm:$0xff] (!%p148_p2)  ;;  %v214_v24 = vld [vmem:[%s763_s2 + $0x98] sm:$0xff] (!%p148_p2) }
   0xb   : > { %v445_v25 = vpack.c.bf16 (!%p148_p2), %v209_v22, %v207_v21  ;;  %v447_v26 = vpack.c.bf16 (!%p148_p2), %v214_v24, %v212_v23  ;;  %v211_v27 = vld [vmem:[%s763_s2 + $0x80] sm:$0xff] (!%p148_p2)  ;;  %v213_v28 = vld [vmem:[%s763_s2 + $0x90] sm:$0xff] (!%p148_p2)  ;;  %v216_v29 = vld [vmem:[%s763_s2 + $0xa8] sm:$0xff] (!%p148_p2) }
   0xc   : > { %v218_v30 = vld [vmem:[%s763_s2 + $0xb8] sm:$0xff] (!%p148_p2)  ;;  %v449_v31 = vpack.c.bf16 (!%p148_p2), %v213_v28, %v211_v27  ;;  %v215_v33 = vld [vmem:[%s763_s2 + $0xa0] sm:$0xff] (!%p148_p2)  ;;  %v217_v34 = vld [vmem:[%s763_s2 + $0xb0] sm:$0xff] (!%p148_p2) }
   0xd   : > { %438 = vmatpush1.bf16.msra.mxu0 %v437_v13  ;;  %s766_s13 = smov (!%p175_p3, %s417_s13), 1  ;;  %v451_v32 = vpack.c.bf16 %v218_v30, %v216_v29  ;;  %v220_v35 = vld [vmem:[%s763_s2 + $0xc8] sm:$0xff]  ;;  %v222_v36 = vld [vmem:[%s763_s2 + $0xd8] sm:$0xff]  ;;  %v453_v37 = vpack.c.bf16 %v217_v34, %v215_v33  ;;  %v219_v39 = vld [vmem:[%s763_s2 + $0xc0] sm:$0xff] }
   0xe   : > { %440 = vmatprep.subr.bf16.mxu0 %v439_v14  ;;  %s429_s6 = sshll.u32 %s766_s13, 4  ;;  %v455_v38 = vpack.c.bf16 %v222_v36, %v220_v35  ;;  %v221_v40 = vld [vmem:[%s763_s2 + $0xd0] sm:$0xff]  ;;  %v224_v42 = vld [vmem:[%s763_s2 + $0xe8] sm:$0xff]  ;;  %v226_v43 = vld [vmem:[%s763_s2 + $0xf8] sm:$0xff] }
   0xf   : > { %s629_s19 = scalar_lea.vmem %s761_s0, %s429_s6  ;;  %s634_s22 = scalar_lea.vmem %s762_s1, %s429_s6  ;;  %v457_v46 = vpack.c.bf16 %v221_v40, %v219_v39  ;;  %v459_v47 = vpack.c.bf16 %v226_v43, %v224_v42  ;;  %v223_v48 = vld [vmem:[%s763_s2 + $0xe0] sm:$0xff]  ;;  %v225_v49 = vld [vmem:[%s763_s2 + $0xf0] sm:$0xff]  ;;  %v228_v50 = vld [vmem:[%s763_s2 + $0x108] sm:$0xff] }
  0x10   : > { %v190_v41 = vld [vmem:[%s629_s19 + $0x8] sm:$0xff]  ;;  %v230_v51 = vld [vmem:[%s763_s2 + $0x118] sm:$0xff]  ;;  %v461_v52 = vpack.c.bf16 %v225_v49, %v223_v48  ;;  %v227_v54 = vld [vmem:[%s763_s2 + $0x100] sm:$0xff] }
  0x11   : > { %442 = vmatpush1.bf16.msra.mxu0 %v441_v19  ;;  %v192_v44 = vld [vmem:[%s634_s22 + $0x8] sm:$0xff]  ;;  %v463_v53 = vpack.c.bf16 %v230_v51, %v228_v50  ;;  %v229_v55 = vld [vmem:[%s763_s2 + $0x110] sm:$0xff]  ;;  %v234_v57 = vld [vmem:[%s763_s2 + $0x138] sm:$0xff]  ;;  %v342_v50 = vlaneseq }
  0x12   : > { %444 = vmatprep.subr.bf16.mxu0 %v443_v20  ;;  %v194_v45 = vsub.f32 %v190_v41, %v192_v44  ;;  %v232_v56 = vld [vmem:[%s763_s2 + $0x128] sm:$0xff]  ;;  %v465_v58 = vpack.c.bf16 %v229_v55, %v227_v54  ;;  %v231_v60 = vld [vmem:[%s763_s2 + $0x120] sm:$0xff]  ;;  %v233_v61 = vld [vmem:[%s763_s2 + $0x130] sm:$0xff] }
  0x13   : > { %v467_v59 = vpack.c.bf16 %v234_v57, %v232_v56  ;;  %v236_v62 = vld [vmem:[%s763_s2 + $0x148] sm:$0xff]  ;;  %v238_v63 = vld [vmem:[%s763_s2 + $0x158] sm:$0xff]  ;;  %v469_v0 = vpack.c.bf16 %v233_v61, %v231_v60  ;;  %v235_v2 = vld [vmem:[%s763_s2 + $0x140] sm:$0xff]  ;;  %v343_v51 = vshrl.u32 %v342_v50, 7 }
  0x14   : > { %323 = vmatprep.mubr.f32.mxu0 %v194_v45  ;;  %v471_v1 = vpack.c.bf16 %v238_v63, %v236_v62  ;;  %v237_v3 = vld [vmem:[%s763_s2 + $0x150] sm:$0xff]  ;;  %v240_v4 = vld [vmem:[%s763_s2 + $0x168] sm:$0xff]  ;;  %v242_v5 = vld [vmem:[%s763_s2 + $0x178] sm:$0xff] }
  0x15   : > { %446 = vmatpush1.bf16.msra.mxu0 %v445_v25  ;;  %v473_v6 = vpack.c.bf16 %v237_v3, %v235_v2  ;;  %v475_v7 = vpack.c.bf16 %v242_v5, %v240_v4  ;;  %v239_v8 = vld [vmem:[%s763_s2 + $0x160] sm:$0xff]  ;;  %v241_v9 = vld [vmem:[%s763_s2 + $0x170] sm:$0xff]  ;;  %v244_v10 = vld [vmem:[%s763_s2 + $0x188] sm:$0xff]  ;;  %vm346_vm0 = vcmp.eq.s32.totalorder %v343_v51, 0 }
  0x16   : > { %448 = vmatprep.subr.bf16.mxu0 %v447_v26  ;;  %v246_v11 = vld [vmem:[%s763_s2 + $0x198] sm:$0xff]  ;;  %v477_v12 = vpack.c.bf16 %v241_v9, %v239_v8  ;;  %v243_v14 = vld [vmem:[%s763_s2 + $0x180] sm:$0xff]  ;;  %v245_v15 = vld [vmem:[%s763_s2 + $0x190] sm:$0xff] }
  0x17   : > { %v479_v13 = vpack.c.bf16 %v246_v11, %v244_v10  ;;  %v248_v16 = vld [vmem:[%s763_s2 + $0x1a8] sm:$0xff]  ;;  %v250_v17 = vld [vmem:[%s763_s2 + $0x1b8] sm:$0xff]  ;;  %v481_v18 = vpack.c.bf16 %v245_v15, %v243_v14  ;;  %v247_v20 = vld [vmem:[%s763_s2 + $0x1a0] sm:$0xff] }
  0x18   : > { %v483_v19 = vpack.c.bf16 %v250_v17, %v248_v16  ;;  %v249_v21 = vld [vmem:[%s763_s2 + $0x1b0] sm:$0xff]  ;;  %v252_v22 = vld [vmem:[%s763_s2 + $0x1c8] sm:$0xff]  ;;  %v254_v23 = vld [vmem:[%s763_s2 + $0x1d8] sm:$0xff] }
  0x19   : > { %450 = vmatpush1.bf16.msra.mxu0 %v449_v31  ;;  %v485_v24 = vpack.c.bf16 %v249_v21, %v247_v20  ;;  %v487_v25 = vpack.c.bf16 %v254_v23, %v252_v22  ;;  %v251_v26 = vld [vmem:[%s763_s2 + $0x1c0] sm:$0xff]  ;;  %v253_v27 = vld [vmem:[%s763_s2 + $0x1d0] sm:$0xff]  ;;  %v256_v28 = vld [vmem:[%s763_s2 + $0x1e8] sm:$0xff] }
  0x1a   : > { %452 = vmatprep.subr.bf16.mxu0 %v451_v32  ;;  %v258_v29 = vld [vmem:[%s763_s2 + $0x1f8] sm:$0xff]  ;;  %v489_v30 = vpack.c.bf16 %v253_v27, %v251_v26  ;;  %v255_v32 = vld [vmem:[%s763_s2 + $0x1e0] sm:$0xff]  ;;  %v257_v33 = vld [vmem:[%s763_s2 + $0x1f0] sm:$0xff] }
  0x1b   : > { %v491_v31 = vpack.c.bf16 %v258_v29, %v256_v28  ;;  %v493_v34 = vpack.c.bf16 %v257_v33, %v255_v32  ;;  %v189_v35 = vld [vmem:[%s629_s19] sm:$0xff]  ;;  %s426_s19 = sshll.u32 %s766_s13, 3 }
  0x1c   : > { %v191_v36 = vld [vmem:[%s634_s22] sm:$0xff]  ;;  %s188_s4 = scalar_lea.vmem %s764_s3, %s426_s19 }
  0x1d   : > { %454 = vmatpush1.bf16.msra.mxu0 %v453_v37  ;;  %v193_v37 = vsub.f32 %v189_v35, %v191_v36 }
  0x1e   : > { %456 = vmatprep.subr.bf16.mxu0 %v455_v38 }
  0x21   : > { %458 = vmatpush1.bf16.msra.mxu0 %v457_v46 }
  0x22   : > { %460 = vmatprep.subr.bf16.mxu0 %v459_v47 }
  0x25   : > { %462 = vmatpush1.bf16.msra.mxu0 %v461_v52  ;;  %v345_v52 = vand.u32 127, %v342_v50 }
  0x26   : > { %464 = vmatprep.subr.bf16.mxu0 %v463_v53 }
  0x27   : > { %vm347_vm1 = vcmp.eq.s32.totalorder %v345_v52, 0 }
  0x28   : > { %vm348_vm2 = vmand %vm346_vm0, %vm347_vm1 }
  0x29   : > { %466 = vmatpush1.bf16.msra.mxu0 %v465_v58 }
  0x2a   : > { %468 = vmatprep.subr.bf16.mxu0 %v467_v59 }
  0x2d   : > { %470 = vmatpush1.bf16.msra.mxu0 %v469_v0 }
  0x2e   : > { %472 = vmatprep.subr.bf16.mxu0 %v471_v1 }
  0x31   : > { %474 = vmatpush1.bf16.msra.mxu0 %v473_v6 }
  0x32   : > { %476 = vmatprep.subr.bf16.mxu0 %v475_v7 }
  0x35   : > { %478 = vmatpush1.bf16.msra.mxu0 %v477_v12 }
  0x36   : > { %480 = vmatprep.subr.bf16.mxu0 %v479_v13 }
  0x39   : > { %482 = vmatpush1.bf16.msra.mxu0 %v481_v18 }
  0x3a   : > { %484 = vmatprep.subr.bf16.mxu0 %v483_v19 }
  0x3d   : > { %486 = vmatpush1.bf16.msra.mxu0 %v485_v24 }
  0x3e   : > { %488 = vmatprep.subr.bf16.mxu0 %v487_v25 }
  0x41   : > { %490 = vmatpush1.bf16.msra.mxu0 %v489_v30 }
  0x42   : > { %492 = vmatprep.subr.bf16.mxu0 %v491_v31 }
  0x45   : > { %494 = vmatpush1.bf16.msra.mxu0 %v493_v34 }
  0x48   : > { %324 = vmatmul.mubr.f32.vlgmr.msra.gmra.mrb[0].mxu0 %v193_v37 }
 0x11b   : > { %v325_v38 = vpop.f32.mrb[0].mxu0 }
 0x11c   : > { %v330_v39 = vand.u32 2147483647, %v325_v38  ;;  %v327_v40 = vpop.f32.mrb[1].mxu0 }
 0x11d   : > { %v331_v41 = vand.u32 2147483647, %v327_v40 }
 0x11f   : > { %v332_v42 = vadd.f32 %v331_v41, %v330_v39 }
 0x121   : > { %333 = vadd.xlane.f32.xlu0 %v332_v42 }
 0x1ae   : > { %v334_v43 = vpop.xlane.xlu0 %333 }
 0x1af   : > { %v335_v44 = vrot.slane %v334_v43, 4 }
 0x1b1   : > { %v336_v45 = vadd.f32 %v335_v44, %v334_v43 }
 0x1b3   : > { %v337_v46 = vrot.slane %v336_v45, 2 }
 0x1b5   : > { %v338_v47 = vadd.f32 %v337_v46, %v336_v45 }
 0x1b7   : > { %v339_v48 = vrot.slane %v338_v47, 1 }
 0x1b9   : > { %v340_v49 = vadd.f32 %v339_v48, %v338_v47 }
 0x1bb   : > { %495 = vpush %v340_v49 }
 0x1ec   : > { %s496_s5 = spop %495 }
 0x1ed   : > { %v349_v53 = vstv %s496_s5 }
 0x1ee   : > { %v350_v54 = vsel %vm348_vm2, %v349_v53, 0.0 }
 0x1ef   : > { %351 = vst [vmem:[%s188_s4] sm:$0xff] %v350_v54 }
 0x1f0 PF: > { %s13_s12 = sadd.s32 1, %s511_s12  }
 0x1f1   : > { %p10_p4 = scmp.ge.s32.totalorder %s13_s12, 4  }
 0x1f3   :  { %12 = sbr.rel (!%p10_p4) target bundleno = 1 (0x1), region = 65 }

</bundles_post_ra>
